<compile_context>
chip_gen: v7x
topology: tpu7x:2x2x1
jax: 0.10.0
libtpu: 0.0.40
codegen_flags: <defaults>
</compile_context>

<pallas_src>
import functools

import numpy as np
import jax
import jax.numpy as jnp
from jax.experimental import pallas as pl
from jax.experimental.pallas import tpu as pltpu

_LANE = 128


def _round_up(x, m):
    return (x + m - 1) // m * m


def _relu(x):
    return jnp.maximum(x, 0.0)


def _sublane_multiple(dtype):
    # f32 -> 8, bf16/f16 -> 16, int8/fp8 -> 32 (packed sublanes).
    return max(8, 32 // np.dtype(dtype).itemsize)


def _choose_tile(dim, tile_max, align):
    """Pick (tile, padded_dim): tile is a multiple of `align`, <= tile_max.

    Prefers minimal padding (padded zeros still cost HBM bandwidth every call),
    then the largest tile (fewer grid steps, less re-streaming of the other
    operand)."""
    padded_min = _round_up(dim, align)
    if padded_min <= tile_max:
        return padded_min, padded_min
    best = None  # (waste, tile, padded)
    for t in range(align, tile_max + 1, align):
        p = _round_up(dim, t)
        waste = p - dim
        if best is None or waste < best[0] or (waste == best[0] and t > best[1]):
            best = (waste, t, p)
    return best[1], best[2]


def _make_kernel(activation):
    def kernel(x_ref, w_ref, b_ref, o_ref, acc_ref):
        # x_ref: (tm, tk)  w_ref: (tk, tn)  b_ref: (1, tn)
        # o_ref: (tm, tn)  acc_ref: (tm, tn) f32 scratch, resident across K.
        k = pl.program_id(2)

        prod = jnp.dot(x_ref[...], w_ref[...], preferred_element_type=jnp.float32)

        @pl.when(k == 0)
        def _():
            # Write first partial product directly (no zero-init store + add).
            acc_ref[...] = prod

        @pl.when(k > 0)
        def _():
            acc_ref[...] += prod

        @pl.when(k == pl.num_programs(2) - 1)
        def _():
            lin = acc_ref[...] + b_ref[...].astype(jnp.float32)
            o_ref[...] = activation(lin).astype(o_ref.dtype)

    return kernel


def prepare_linear_params(w, b, *, compute_dtype=jnp.bfloat16,
                          tn_max=512, tk_max=512):
    """Pad + cast the weight/bias ONCE (module init), outside the hot path.

    w: [in_feats, out_feats] (transposed vs. torch's [out_feats, in_feats]),
    b: [out_feats]. compute_dtype=None keeps w's dtype for the MXU inputs.
    """
    in_feats, out_feats = w.shape
    assert b.shape == (out_feats,)
    tk, kp = _choose_tile(in_feats, tk_max, _LANE)
    tn, np_ = _choose_tile(out_feats, tn_max, _LANE)
    wp = jnp.pad(w, ((0, kp - in_feats), (0, np_ - out_feats)))
    if compute_dtype is not None:
        wp = wp.astype(compute_dtype)
    # Bias stays in f32: it is added to the f32 accumulator in the epilogue.
    bp = jnp.pad(b.astype(jnp.float32), (0, np_ - out_feats)).reshape(1, np_)
    return {"wp": wp, "bp": bp, "out_feats": out_feats, "tn": tn, "tk": tk}


@functools.partial(
    jax.jit, static_argnames=("out_feats", "tn", "tk", "activation", "tm_max"))
def _linear_forward(x, wp, bp, *, out_feats, tn, tk, activation=_relu,
                    tm_max=512):
    batch, in_feats = x.shape
    kp, np_ = wp.shape
    out_dtype = x.dtype

    # M tile: cover the whole (rounded) batch when small -> W streams once.
    sub = _sublane_multiple(out_dtype)
    tm, mp = _choose_tile(batch, tm_max, sub)

    # Megacore (v7x, 2 TCs): guarantee >= 2 blocks on a parallel axis. If both
    # M and N collapsed to one block, split N so each core reads disjoint W
    # column tiles (no duplicated weight traffic).
    if mp // tm == 1 and np_ // tn == 1 and np_ % (2 * _LANE) == 0:
        tn = np_ // 2

    # Only the (small) activation is padded/cast per call; W/b were prepared.
    xp = x.astype(wp.dtype)
    if (mp, kp) != (batch, in_feats):
        xp = jnp.pad(xp, ((0, mp - batch), (0, kp - in_feats)))

    grid = (mp // tm, np_ // tn, kp // tk)

    out_p = pl.pallas_call(
        _make_kernel(activation),
        out_shape=jax.ShapeDtypeStruct((mp, np_), out_dtype),
        grid_spec=pltpu.PrefetchScalarGridSpec(
            num_scalar_prefetch=0,
            grid=grid,
            in_specs=[
                pl.BlockSpec((tm, tk), lambda i, j, k: (i, k)),
                pl.BlockSpec((tk, tn), lambda i, j, k: (k, j)),
                # Bias index_map ignores k: fetched once per j tile, resident
                # across the whole K reduction.
                pl.BlockSpec((1, tn), lambda i, j, k: (0, j)),
            ],
            out_specs=pl.BlockSpec((tm, tn), lambda i, j, k: (i, j)),
            scratch_shapes=[pltpu.VMEM((tm, tn), jnp.float32)],
        ),
        compiler_params=pltpu.CompilerParams(
            dimension_semantics=("parallel", "parallel", "arbitrary"),
        ),
    )(xp, wp, bp)

    return out_p[:batch, :out_feats]


def linear_forward(x, params, *, activation=_relu, tm_max=512):
    """Forward pass with pre-prepared (padded/cast) parameters."""
    return _linear_forward(
        x, params["wp"], params["bp"], out_feats=params["out_feats"],
        tn=params["tn"], tk=params["tk"], activation=activation, tm_max=tm_max)


def linear_layer(x, w, b, *, activation=_relu, compute_dtype=jnp.bfloat16,
                 tm_max=512, tn_max=512, tk_max=512):
    """One-shot convenience: activation(x @ w + b). Prefer preparing params
    once via prepare_linear_params() + linear_forward() in real use."""
    params = prepare_linear_params(w, b, compute_dtype=compute_dtype,
                                   tn_max=tn_max, tk_max=tk_max)
    return linear_forward(x, params, activation=activation, tm_max=tm_max)


if __name__ == "__main__":
    key = jax.random.PRNGKey(0)
    kx, kw, kb, kx2, kw2, kb2 = jax.random.split(key, 6)

    # --- Small shape implied by the module (batch of feature vectors). ------
    batch, in_feats, out_feats = 8, 32, 64
    bound = in_feats ** -0.5
    x = jax.random.normal(kx, (batch, in_feats), dtype=jnp.float32)
    w = jax.random.uniform(kw, (in_feats, out_feats), jnp.float32, -bound, bound)
    b = jax.random.uniform(kb, (out_feats,), jnp.float32, -bound, bound)

    # Exact f32 path (compute_dtype=f32) through the prepared-params API.
    params = prepare_linear_params(w, b, compute_dtype=jnp.float32)
    out = linear_forward(x, params)
    jax.block_until_ready(out)
    ref = jnp.maximum(x @ w + b, 0.0)
    assert out.shape == (batch, out_feats)
    assert jnp.allclose(out, ref, atol=1e-5, rtol=1e-5)

    # --- Larger non-multiple shape: K-accumulation grid, padded N edge, -----
    # --- tm covering the whole batch, bf16 MXU inputs (default).        -----
    B2, IN2, OUT2 = 384, 1024, 640
    bound2 = IN2 ** -0.5
    x2 = jax.random.normal(kx2, (B2, IN2), dtype=jnp.float32)
    w2 = jax.random.uniform(kw2, (IN2, OUT2), jnp.float32, -bound2, bound2)
    b2 = jax.random.uniform(kb2, (OUT2,), jnp.float32, -bound2, bound2)
    ref2 = jnp.maximum(x2 @ w2 + b2, 0.0)

    params2 = prepare_linear_params(w2, b2)        # bf16 compute by default
    out2 = linear_forward(x2, params2)             # W padded/cast only once
    jax.block_until_ready(out2)
    assert out2.shape == (B2, OUT2) and out2.dtype == jnp.float32
    assert float(jnp.max(jnp.abs(out2 - ref2))) < 0.1

    # Exact f32 accumulation check over the multi-step K grid (convenience API).
    out2_f32 = linear_layer(x2, w2, b2, compute_dtype=jnp.float32)
    jax.block_until_ready(out2_f32)
    assert jnp.allclose(out2_f32, ref2, atol=5e-4, rtol=5e-4)

    # TODO(synk): the PyTorch module accepts an arbitrary `activation` callable;
    # here it must be a purely elementwise jnp function (default ReLU) — row- or
    # column-dependent activations (e.g. softmax) would be wrong across tiles.

    print("KERNEL_OK")
</pallas_src>

<mosaic_0001>
module attributes {stable_mosaic.version = 11 : i64} {
  func.func @kernel(%arg0: i32, %arg1: i32, %arg2: i32, %arg3: memref<8x128xf32, #tpu.memory_space<vmem>>, %arg4: memref<128x128xf32, #tpu.memory_space<vmem>>, %arg5: memref<1x128xf32, #tpu.memory_space<vmem>>, %arg6: memref<8x128xf32, #tpu.memory_space<vmem>>, %arg7: memref<8x128xf32, #tpu.memory_space<vmem>>) attributes {dimension_semantics = [#tpu.dimension_semantics<parallel>, #tpu.dimension_semantics<parallel>, #tpu.dimension_semantics<arbitrary>], iteration_bounds = array<i64: 1, 1, 1>, scalar_prefetch = 0 : i64, scratch_operands = 1 : i64, tpu.core_type = #tpu.core_type<tc>, window_params = [{transform_indices = @transform_0, window_bounds = array<i64: 8, 128>}, {transform_indices = @transform_1, window_bounds = array<i64: 128, 128>}, {transform_indices = @transform_2, window_bounds = array<i64: 1, 128>}, {transform_indices = @transform_3, window_bounds = array<i64: 8, 128>}]} {
    %c0 = arith.constant 0 : index
    %c0_0 = arith.constant 0 : index
    %0 = vector.load %arg3[%c0, %c0_0] : memref<8x128xf32, #tpu.memory_space<vmem>>, vector<8x128xf32>
    %c0_1 = arith.constant 0 : index
    %c0_2 = arith.constant 0 : index
    %1 = vector.load %arg4[%c0_1, %c0_2] : memref<128x128xf32, #tpu.memory_space<vmem>>, vector<128x128xf32>
    %cst = arith.constant dense<0.000000e+00> : vector<8x128xf32>
    %2 = tpu.matmul %0, %1, %cst {dimension_numbers = #tpu.dot_dimension_numbers<[1], [0], [0], [1], [0, 0, 1, 1], [], []>} : vector<8x128xf32>, vector<128x128xf32>, vector<8x128xf32> -> vector<8x128xf32>
    %c0_i32 = arith.constant 0 : i32
    %3 = arith.cmpi eq, %arg2, %c0_i32 : i32
    %4 = arith.extui %3 : i1 to i32
    %c0_i32_3 = arith.constant 0 : i32
    %5 = arith.cmpi ne, %4, %c0_i32_3 : i32
    scf.if %5 {
      %c0_8 = arith.constant 0 : index
      %c0_9 = arith.constant 0 : index
      %12 = vector.load %arg7[%c0_8, %c0_9] : memref<8x128xf32, #tpu.memory_space<vmem>>, vector<8x128xf32>
      tpu.vector_store %arg7[%c0_8, %c0_9], %2 {strides = array<i32>} : memref<8x128xf32, #tpu.memory_space<vmem>>, vector<8x128xf32>,
    } else {
    }
    %c0_i32_4 = arith.constant 0 : i32
    %6 = arith.cmpi sgt, %arg2, %c0_i32_4 : i32
    %7 = arith.extui %6 : i1 to i32
    %c0_i32_5 = arith.constant 0 : i32
    %8 = arith.cmpi ne, %7, %c0_i32_5 : i32
    scf.if %8 {
      %c0_8 = arith.constant 0 : index
      %c0_9 = arith.constant 0 : index
      %12 = vector.load %arg7[%c0_8, %c0_9] : memref<8x128xf32, #tpu.memory_space<vmem>>, vector<8x128xf32>
      %13 = arith.addf %12, %2 : vector<8x128xf32>
      %c0_10 = arith.constant 0 : index
      %c0_11 = arith.constant 0 : index
      %14 = vector.load %arg7[%c0_10, %c0_11] : memref<8x128xf32, #tpu.memory_space<vmem>>, vector<8x128xf32>
      tpu.vector_store %arg7[%c0_10, %c0_11], %13 {strides = array<i32>} : memref<8x128xf32, #tpu.memory_space<vmem>>, vector<8x128xf32>,
    } else {
    }
    %c0_i32_6 = arith.constant 0 : i32
    %9 = arith.cmpi eq, %arg2, %c0_i32_6 : i32
    %10 = arith.extui %9 : i1 to i32
    %c0_i32_7 = arith.constant 0 : i32
    %11 = arith.cmpi ne, %10, %c0_i32_7 : i32
    scf.if %11 {
      %c0_8 = arith.constant 0 : index
      %c0_9 = arith.constant 0 : index
      %12 = vector.load %arg7[%c0_8, %c0_9] : memref<8x128xf32, #tpu.memory_space<vmem>>, vector<8x128xf32>
      %c0_10 = arith.constant 0 : index
      %c0_11 = arith.constant 0 : index
      %13 = vector.load %arg5[%c0_10, %c0_11] : memref<1x128xf32, #tpu.memory_space<vmem>>, vector<1x128xf32>
      %14 = vector.broadcast %13 : vector<1x128xf32> to vector<8x128xf32>
      %15 = arith.addf %12, %14 : vector<8x128xf32>
      %cst_12 = arith.constant 0.000000e+00 : f32
      %16 = vector.broadcast %cst_12 : f32 to vector<8x128xf32>
      %17 = arith.maximumf %15, %16 : vector<8x128xf32>
      %c0_13 = arith.constant 0 : index
      %c0_14 = arith.constant 0 : index
      %18 = vector.load %arg6[%c0_13, %c0_14] : memref<8x128xf32, #tpu.memory_space<vmem>>, vector<8x128xf32>
      tpu.vector_store %arg6[%c0_13, %c0_14], %17 {strides = array<i32>} : memref<8x128xf32, #tpu.memory_space<vmem>>, vector<8x128xf32>,
    } else {
    }
    return
  }
  func.func @transform_0(%arg0: i32, %arg1: i32, %arg2: i32) -> (i32, i32) {
    %c0_i32 = arith.constant 0 : i32
    return %arg0, %arg2 : i32, i32
  }
  func.func @transform_1(%arg0: i32, %arg1: i32, %arg2: i32) -> (i32, i32) {
    %c0_i32 = arith.constant 0 : i32
    return %arg2, %arg1 : i32, i32
  }
  func.func @transform_2(%arg0: i32, %arg1: i32, %arg2: i32) -> (i32, i32) {
    %c0_i32 = arith.constant 0 : i32
    %c0_i32_0 = arith.constant 0 : i32
    return %c0_i32, %arg1 : i32, i32
  }
  func.func @transform_3(%arg0: i32, %arg1: i32, %arg2: i32) -> (i32, i32) {
    %c0_i32 = arith.constant 0 : i32
    return %arg0, %arg1 : i32, i32
  }
}

</mosaic_0001>

<bundles_post_ra>
// kernel: _linear_forward.1
= control target key start
LH: loop header
LB: loop body
LE: loop exit
PB: predicated region body
PF: predicated region fallthrough
CT: control target
= control target key end

     0   :  { %8 = vsyncpa [#allocation4], 0  ;;  %s346_s0 = inlined_call_operand.vmem [shape: f32[8,128], index: 0, kind: input, shape index: {}]   ;;  %s347_s1 = inlined_call_operand.hbm [shape: f32[128,128], index: 1, kind: input, shape index: {}]   ;;  %s348_s2 = inlined_call_operand.vmem [shape: f32[1,128], index: 2, kind: input, shape index: {}]   ;;  %s349_s3 = inlined_call_operand.hbm [shape: f32[8,128], index: 3, kind: output, shape index: {}]  }
   0x1   :  { %9 = vsyncpa [#allocation5], 0  ;;  %s289_s12 = smov [#allocation3]   ;;  %s241_s16 = scalar_lea.hbm %s347_s1, 2048 }
   0x2   :  { %s17_s13 = sshll.u32 %s289_s12, 4  ;;  %p242_p0 = scmp.ne.s32.totalorder %s347_s1, %s241_s16  ;;  %s18_s13 = int_to_ptr.vmem [resolvable:$true] %s17_s13 }
   0x3   :  { %p245_p1 = scmp.lt.u32.totalorder %s241_s16, %s347_s1 }
   0x5   :  { %p247_p2 = pnand %p245_p1, %p242_p0 }
   0x7   :  { %250 = shalt.err (!%p247_p2)
}
   0x8   :  { %s251_s21 = scalar_lea.vmem %s18_s13, 2048  ;;  %p256_p4 = scmp.lt.s32.totalorder %s18_s13, %s18_s13 }
   0x9   :  { %p252_p3 = scmp.ne.s32.totalorder %s18_s13, %s251_s21  ;;  %p257_p5 = scmp.lt.s32.totalorder %s251_s21, %s251_s21 }
   0xb   :  { %p258_p6 = por %p257_p5, %p256_p4 }
   0xd   :  { %p259_p7 = pnand %p258_p6, %p252_p3 }
   0xf   :  { %262 = shalt.err (!%p259_p7)
}
  0x10   :  { %s290_s22 = smov 128   ;;  %s291_s23 = smov 8  }
  0x11   :  { %23 = dma.hbm_to_vmem [thread:$0]  %s347_s1, 2048, %s18_s13, [#allocation4], %s290_s22, %s290_s22, %s291_s23  }
  0x12   :  { %285 = dma.done.wait [#allocation4], 2048  }
  0x13   :  { %286 = vsyncadd [#allocation4], 4294965248  ;;  %v292_v0 = vmov 0.0|0.0   ;;  %vm293_vm0 = vmmov 0   ;;  %v294_v1 = vmov 0.0   ;;  %v30_v2 = vld [vmem:[#allocation3] sm:$0xff] }
  0x14   :  { %210 = vmatprep.subr.bf16.mxu0 %v292_v0  ;;  %207 = vmatprep.mubr.msk.f32.mxu0 %vm293_vm0, %v294_v1  ;;  %v31_v3 = vld [vmem:[#allocation3 + $0x8] sm:$0xff]  ;;  %v32_v4 = vld [vmem:[#allocation3 + $0x10] sm:$0xff]  ;;  %v33_v6 = vld [vmem:[#allocation3 + $0x18] sm:$0xff]  ;;  %s295_s29 = smov [#allocation6]  }
  0x15   :  { %v211_v5 = vpack.c.bf16 %v31_v3, %v30_v2  ;;  %v214_v7 = vpack.c.bf16 %v33_v6, %v32_v4  ;;  %v34_v8 = vld [vmem:[#allocation3 + $0x20] sm:$0xff]  ;;  %v35_v9 = vld [vmem:[#allocation3 + $0x28] sm:$0xff]  ;;  %v36_v11 = vld [vmem:[#allocation3 + $0x30] sm:$0xff]  ;;  %s148_s30 = sshll.u32 %s295_s29, 4  ;;  %s149_s30 = int_to_ptr.vmem [resolvable:$true] %s148_s30 }
  0x16   :  { %v217_v10 = vpack.c.bf16 %v35_v9, %v34_v8  ;;  %v37_v12 = vld [vmem:[#allocation3 + $0x38] sm:$0xff]  ;;  %v38_v14 = vld [vmem:[#allocation3 + $0x40] sm:$0xff]  ;;  %v39_v15 = vld [vmem:[#allocation3 + $0x48] sm:$0xff]  ;;  %s263_s4 = scalar_lea.vmem %s149_s30, 128  ;;  %p268_p9 = scmp.lt.s32.totalorder %s149_s30, %s149_s30 }
  0x17   :  { %212 = vmatpush3.bf16.msra.mxu0 %v211_v5  ;;  %v220_v13 = vpack.c.bf16 %v37_v12, %v36_v11  ;;  %v223_v16 = vpack.c.bf16 %v39_v15, %v38_v14  ;;  %v40_v17 = vld [vmem:[#allocation3 + $0x50] sm:$0xff]  ;;  %v41_v18 = vld [vmem:[#allocation3 + $0x58] sm:$0xff]  ;;  %v42_v20 = vld [vmem:[#allocation3 + $0x60] sm:$0xff]  ;;  %p264_p8 = scmp.ne.s32.totalorder %s149_s30, %s263_s4  ;;  %p269_p10 = scmp.lt.s32.totalorder %s263_s4, %s263_s4 }
  0x18   :  { %213 = vmatprep.subr.bf16.mxu0 %v292_v0  ;;  %v226_v19 = vpack.c.bf16 %v41_v18, %v40_v17  ;;  %v43_v21 = vld [vmem:[#allocation3 + $0x68] sm:$0xff]  ;;  %v44_v23 = vld [vmem:[#allocation3 + $0x70] sm:$0xff]  ;;  %v45_v24 = vld [vmem:[#allocation3 + $0x78] sm:$0xff] }
  0x19   :  { %v229_v22 = vpack.c.bf16 %v43_v21, %v42_v20  ;;  %v232_v25 = vpack.c.bf16 %v45_v24, %v44_v23  ;;  %v29_v26 = vld [vmem:[%s346_s0] sm:$0xff]  ;;  %p270_p11 = por %p269_p10, %p268_p9 }
  0x1a   :  { %v157_v27 = vld [vmem:[%s348_s2] ss:$0 sm:$0xff] }
  0x1b   :  { %215 = vmatpush3.bf16.msra.mxu0 %v214_v7  ;;  %p271_p12 = pnand %p270_p11, %p264_p8 }
  0x1c   :  { %216 = vmatprep.subr.bf16.mxu0 %v292_v0 }
  0x1f   :  { %218 = vmatpush3.bf16.msra.mxu0 %v217_v10 }
  0x20   :  { %219 = vmatprep.subr.bf16.mxu0 %v292_v0 }
  0x23   :  { %221 = vmatpush3.bf16.msra.mxu0 %v220_v13 }
  0x24   :  { %222 = vmatprep.subr.bf16.mxu0 %v292_v0 }
  0x27   :  { %224 = vmatpush3.bf16.msra.mxu0 %v223_v16 }
  0x28   :  { %225 = vmatprep.subr.bf16.mxu0 %v292_v0 }
  0x2b   :  { %227 = vmatpush3.bf16.msra.mxu0 %v226_v19 }
  0x2c   :  { %228 = vmatprep.subr.bf16.mxu0 %v292_v0 }
  0x2f   :  { %230 = vmatpush3.bf16.msra.mxu0 %v229_v22 }
  0x30   :  { %231 = vmatprep.subr.bf16.mxu0 %v292_v0 }
  0x33   :  { %233 = vmatpush3.bf16.msra.mxu0 %v232_v25 }
  0x36   :  { %208 = vmatmul.mubr.f32.vlgmr.msra.gmra.mrb[0].mxu0 %v29_v26 }
 0x109   :  { %v112_v28 = vpop.f32.mrb[0].mxu0 }
 0x10a   :  { %v139_v29 = vadd.f32 %v157_v27, %v112_v28  ;;  %v209_v30 = vpop.f32.mrb[1].mxu0 }
 0x10c   :  { %v140_v31 = vmax.f32 %v139_v29, 0.0 }
 0x10e   :  { %141 = vst [vmem:[#allocation6] sm:$0xff] %v140_v31 }
 0x10f   :  { %274 = shalt.err (!%p271_p12)
}
 0x110   :  { %s275_s6 = scalar_lea.hbm %s349_s3, 128 }
 0x111   :  { %p276_p13 = scmp.ne.s32.totalorder %s349_s3, %s275_s6  ;;  %p279_p0 = scmp.lt.u32.totalorder %s275_s6, %s349_s3 }
 0x113   :  { %p281_p1 = pnand %p279_p0, %p276_p13 }
 0x115   :  { %284 = shalt.err (!%p281_p1)
}
 0x116   :  { %151 = dma.vmem_to_hbm [thread:$0]  %s149_s30, 128, %s349_s3, [#allocation5]  }
 0x117   :  { %287 = dma.done.wait [#allocation5], 128  }
 0x118   :  { %288 = vsyncadd [#allocation5], 4294967168 }
 0x119   :  { %155 = vsyncpa [#allocation4], 1 }
 0x11a   :  { %156 = vsyncpa [#allocation5], 1 }

</bundles_post_ra>
